<compile_context>
chip_gen: v7x
topology: tpu7x:2x2x1
jax: 0.10.0
libtpu: 0.0.40
codegen_flags: <defaults>
</compile_context>

<pallas_src>
import jax
import jax.numpy as jnp
from jax.experimental import pallas as pl
from jax.experimental.pallas import tpu as pltpu

_SUBLANE = 8
_MAX_TILE_N = 8192  # rows; with D=128 f32 this is ~4 MiB per buffer


def _round_up(x, m):
    return (x + m - 1) // m * m


def _device_kind():
    try:
        return jax.devices()[0].device_kind.lower()
    except Exception:
        return ""


def planar_flow_kernel(z_ref, wu_ref, b_ref, o_ref):
    # z_ref: (tile_n, D)  wu_ref: (2, D) = [w; u]  b_ref: (1,) in SMEM
    w = wu_ref[0:1, :].astype(jnp.float32)          # (1, D)
    u = wu_ref[1:2, :].astype(jnp.float32)          # (1, D)
    b = b_ref[0]                                    # scalar read from SMEM

    # <z, w> + b -> (tile_n, 1): widen to f32 only for the reduction
    # (lane-axis reduction on the XLU, accumulate in f32).
    linear = jnp.sum(z_ref[...].astype(jnp.float32) * w, axis=-1,
                     keepdims=True) + b
    # tanh on the EUP; final add in the native z dtype (no full f32 tile copy
    # kept live when z is bf16 on v6e/v7x).
    o_ref[...] = z_ref[...] + (u * jnp.tanh(linear)).astype(o_ref.dtype)


def planar_flow(z, w, u, b, *, tile_n=None):
    """PlanarFlow forward T(z) = z + u * tanh(z @ w.T + b).

    z: (N, D); w, u: (1, D); b: (1,).  Returns (N, D) in z.dtype.
    """
    N, D = z.shape
    dtype = z.dtype

    kind = _device_kind()
    is_v7 = ("v7" in kind) or ("7x" in kind)
    newer_gen = is_v7 or ("v6" in kind)

    # Working-set budget for pipelined buffers; both values stay below the
    # default scoped VMEM limit (16 MiB v5e, 32 MiB v6e/v7x) so no
    # vmem_limit_bytes override is required.
    vmem_budget = (24 if newer_gen else 12) * 1024 * 1024

    use_core_parallel = is_v7 and hasattr(pltpu, "CORE_PARALLEL")
    dim_sem = (pltpu.CORE_PARALLEL,) if use_core_parallel else ("parallel",)

    # ---- pick a VMEM-sized batch tile (multiple of 8) -----------------------
    if tile_n is None:
        item = jnp.dtype(dtype).itemsize
        # 2 double-buffered input tiles + 2 output tiles (native dtype) plus
        # ~2 f32-wide in-kernel temporaries per element.
        bytes_per_row = D * (2 * item + 2 * item + 2 * 4)
        tile_n = min(vmem_budget // max(bytes_per_row, 1), _MAX_TILE_N)
        if use_core_parallel:
            # keep >= ~4 grid steps so both v7x TensorCores stay busy and the
            # DMA pipeline still overlaps.
            tile_n = min(tile_n, max(_SUBLANE, -(-N // 4)))
    tile_n = max(_SUBLANE, (int(tile_n) // _SUBLANE) * _SUBLANE)
    tile_n = min(tile_n, max(_SUBLANE, _round_up(N, _SUBLANE)))

    grid = (pl.cdiv(N, tile_n),)   # ragged last block handled by Pallas

    wu = jnp.concatenate([w, u], axis=0)          # (2, D) replicated input
    b_smem = b.reshape(1).astype(jnp.float32)     # scalar in SMEM

    out = pl.pallas_call(
        planar_flow_kernel,
        out_shape=jax.ShapeDtypeStruct((N, D), dtype),
        grid_spec=pltpu.PrefetchScalarGridSpec(
            num_scalar_prefetch=0,
            grid=grid,
            in_specs=[
                pl.BlockSpec((tile_n, D), lambda i: (i, 0)),        # z tile
                pl.BlockSpec((2, D), lambda i: (0, 0)),             # [w; u]
                pl.BlockSpec(memory_space=pltpu.MemorySpace.SMEM),  # b scalar
            ],
            out_specs=pl.BlockSpec((tile_n, D), lambda i: (i, 0)),
        ),
        # NOTE: if a profile ever shows exposed DMA gaps at step boundaries,
        # add pipeline_mode=pl.Buffered(3) on the z/out BlockSpecs.
        compiler_params=pltpu.CompilerParams(dimension_semantics=dim_sem),
    )(z, wu, b_smem)

    return out


if __name__ == "__main__":
    key = jax.random.PRNGKey(0)
    k_z, k_w, k_u, k_b = jax.random.split(key, 4)

    # Small shapes consistent with the module. N=12, D=32 exercises the ragged
    # (masked) last block and a non-lane-multiple feature dim.
    N, D = 12, 32

    # Deterministic parameter init matching nn.Parameter.uniform_(-0.01, 0.01)
    w = jax.random.uniform(k_w, (1, D), jnp.float32, -0.01, 0.01)
    u = jax.random.uniform(k_u, (1, D), jnp.float32, -0.01, 0.01)
    b = jax.random.uniform(k_b, (1,), jnp.float32, -0.01, 0.01)
    z = jax.random.normal(k_z, (N, D), jnp.float32)

    out = jax.block_until_ready(planar_flow(z, w, u, b))
    ref = z + u * jnp.tanh(z @ w.T + b)
    assert out.shape == ref.shape
    assert jnp.allclose(out, ref, atol=1e-5, rtol=1e-5), "mismatch vs reference"

    # Second check: multi-tile grid + non-divisible N (ragged last block) +
    # non-128-multiple D.
    N2, D2 = 104, 160
    z2 = jax.random.normal(jax.random.PRNGKey(1), (N2, D2), jnp.float32)
    w2 = jax.random.uniform(k_w, (1, D2), jnp.float32, -0.01, 0.01)
    u2 = jax.random.uniform(k_u, (1, D2), jnp.float32, -0.01, 0.01)
    out2 = jax.block_until_ready(planar_flow(z2, w2, u2, b, tile_n=16))
    ref2 = z2 + u2 * jnp.tanh(z2 @ w2.T + b)
    assert jnp.allclose(out2, ref2, atol=1e-5, rtol=1e-5), \
        "mismatch vs reference (case 2)"

    # TODO(synk): log_det_jac / psi / h_prime helpers are not part of forward()
    # and are not implemented here.
    print("KERNEL_OK")
</pallas_src>

<mosaic_0001>
module attributes {stable_mosaic.version = 11 : i64} {
  func.func @planar_flow_kernel(%arg0: i32, %arg1: memref<16x32xf32, #tpu.memory_space<vmem>>, %arg2: memref<2x32xf32, #tpu.memory_space<vmem>>, %arg3: memref<1xf32, #tpu.memory_space<smem>>, %arg4: memref<16x32xf32, #tpu.memory_space<vmem>>) attributes {dimension_semantics = [#tpu.dimension_semantics<parallel>], iteration_bounds = array<i64: 1>, scalar_prefetch = 0 : i64, scratch_operands = 0 : i64, tpu.core_type = #tpu.core_type<tc>, window_params = [{transform_indices = @transform_0, window_bounds = array<i64: 16, 32>}, {pipeline_mode = #tpu.pipeline_mode<synchronous>, transform_indices = @transform_1, window_bounds = array<i64: 2, 32>}, {transform_indices = @transform_2, window_bounds = array<i64: 1>}, {transform_indices = @transform_3, window_bounds = array<i64: 16, 32>}]} {
    %c0 = arith.constant 0 : index
    %c0_0 = arith.constant 0 : index
    %0 = vector.load %arg2[%c0, %c0_0] : memref<2x32xf32, #tpu.memory_space<vmem>>, vector<1x32xf32>
    %c1 = arith.constant 1 : index
    %c0_1 = arith.constant 0 : index
    %1 = vector.load %arg2[%c1, %c0_1] : memref<2x32xf32, #tpu.memory_space<vmem>>, vector<1x32xf32>
    %c0_2 = arith.constant 0 : index
    %2 = memref.load %arg3[%c0_2] : memref<1xf32, #tpu.memory_space<smem>>
    %c0_3 = arith.constant 0 : index
    %c0_4 = arith.constant 0 : index
    %3 = vector.load %arg1[%c0_3, %c0_4] : memref<16x32xf32, #tpu.memory_space<vmem>>, vector<16x32xf32>
    %4 = vector.broadcast %0 : vector<1x32xf32> to vector<16x32xf32>
    %5 = arith.mulf %3, %4 : vector<16x32xf32>
    %cst = arith.constant dense<0.000000e+00> : vector<16xf32>
    %6 = vector.multi_reduction <add>, %5, %cst [1] : vector<16x32xf32> to vector<16xf32>
    %7 = vector.shape_cast %6 : vector<16xf32> to vector<16x1xf32>
    %8 = vector.broadcast %2 : f32 to vector<16x1xf32>
    %9 = arith.addf %7, %8 : vector<16x1xf32>
    %c0_5 = arith.constant 0 : index
    %c0_6 = arith.constant 0 : index
    %10 = vector.load %arg1[%c0_5, %c0_6] : memref<16x32xf32, #tpu.memory_space<vmem>>, vector<16x32xf32>
    %11 = math.tanh %9 : vector<16x1xf32>
    %12 = vector.broadcast %1 : vector<1x32xf32> to vector<16x32xf32>
    %13 = vector.broadcast %11 : vector<16x1xf32> to vector<16x32xf32>
    %14 = arith.mulf %12, %13 : vector<16x32xf32>
    %15 = arith.addf %10, %14 : vector<16x32xf32>
    %c0_7 = arith.constant 0 : index
    %c0_8 = arith.constant 0 : index
    %16 = vector.load %arg4[%c0_7, %c0_8] : memref<16x32xf32, #tpu.memory_space<vmem>>, vector<16x32xf32>
    tpu.vector_store %arg4[%c0_7, %c0_8], %15 {strides = array<i32>} : memref<16x32xf32, #tpu.memory_space<vmem>>, vector<16x32xf32>,
    return
  }
  func.func @transform_0(%arg0: i32) -> (i32, i32) {
    %c0_i32 = arith.constant 0 : i32
    %c0_i32_0 = arith.constant 0 : i32
    return %arg0, %c0_i32 : i32, i32
  }
  func.func @transform_1(%arg0: i32) -> (i32, i32) {
    %c0_i32 = arith.constant 0 : i32
    %c0_i32_0 = arith.constant 0 : i32
    %c0_i32_1 = arith.constant 0 : i32
    return %c0_i32, %c0_i32_0 : i32, i32
  }
  func.func @transform_2(%arg0: i32) -> i32 {
    %c0_i32 = arith.constant 0 : i32
    %c0_i32_0 = arith.constant 0 : i32
    return %c0_i32 : i32
  }
  func.func @transform_3(%arg0: i32) -> (i32, i32) {
    %c0_i32 = arith.constant 0 : i32
    %c0_i32_0 = arith.constant 0 : i32
    return %arg0, %c0_i32 : i32, i32
  }
}

</mosaic_0001>

<bundles_post_ra>
// kernel: tpu_custom_call.1
= control target key start
LH: loop header
LB: loop body
LE: loop exit
PB: predicated region body
PF: predicated region fallthrough
CT: control target
= control target key end

     0   :  { %9 = vsyncpa [#allocation4], 0  ;;  %s205_s0 = inlined_call_operand.hbm [shape: f32[12,32], index: 0, kind: input, shape index: {}]   ;;  %s206_s1 = inlined_call_operand.vmem [shape: f32[2,32], index: 1, kind: input, shape index: {}]   ;;  %s207_s2 = inlined_call_operand.<no memory space> [shape: f32[1], index: 2, kind: input, shape index: {}]   ;;  %s208_s3 = inlined_call_operand.hbm [shape: f32[12,32], index: 3, kind: output, shape index: {}]  }
   0x1   :  { %10 = vsyncpa [#allocation5], 0  ;;  %s138_s12 = smov [#allocation3]   ;;  %s90_s16 = scalar_lea.hbm %s205_s0, 256 }
   0x2   :  { %s16_s13 = sshll.u32 %s138_s12, 4  ;;  %p91_p0 = scmp.ne.s32.totalorder %s205_s0, %s90_s16  ;;  %s17_s13 = int_to_ptr.vmem [resolvable:$true] %s16_s13 }
   0x3   :  { %p94_p1 = scmp.lt.u32.totalorder %s90_s16, %s205_s0 }
   0x5   :  { %p96_p2 = pnand %p94_p1, %p91_p0 }
   0x7   :  { %99 = shalt.err (!%p96_p2)
}
   0x8   :  { %s100_s21 = scalar_lea.vmem %s17_s13, 256  ;;  %p105_p4 = scmp.lt.s32.totalorder %s17_s13, %s17_s13 }
   0x9   :  { %p101_p3 = scmp.ne.s32.totalorder %s17_s13, %s100_s21  ;;  %p106_p5 = scmp.lt.s32.totalorder %s100_s21, %s100_s21 }
   0xb   :  { %p107_p6 = por %p106_p5, %p105_p4 }
   0xd   :  { %p108_p7 = pnand %p107_p6, %p101_p3 }
   0xf   :  { %111 = shalt.err (!%p108_p7)
}
  0x10   :  { %s139_s22 = smov 128   ;;  %s140_s23 = smov 8  }
  0x11   :  { %22 = dma.hbm_to_vmem [thread:$0]  %s205_s0, 256, %s17_s13, [#allocation4], %s139_s22, %s139_s22, %s140_s23  }
  0x12   :  { %134 = dma.done.wait [#allocation4], 256  }
  0x13   :  { %135 = vsyncadd [#allocation4], 4294967040  ;;  %v80_v0 = vld [vmem:[%s206_s1] ss:$0 sm:$0xff]  ;;  %vm41_vm0 = vcmask 261120   ;;  %v34_v2 = vld [vmem:[#allocation3 + $0x8] sm:$0xff]  ;;  %v48_v7 = vstv %s207_s2 }
  0x14   :  { %v33_v1 = vld [vmem:[#allocation3] sm:$0xff]  ;;  %v40_v4 = vmul.f32 %v80_v0, %v34_v2  ;;  %s141_s4 = smov [#allocation6]  }
  0x15   :  { %v39_v3 = vmul.f32 %v80_v0, %v33_v1  ;;  %v81_v12 = vld [vmem:[%s206_s1 + $0x1] ss:$0 sm:$0xff]  ;;  %s68_s5 = sshll.u32 %s141_s4, 4  ;;  %s69_s5 = int_to_ptr.vmem [resolvable:$true] %s68_s5 }
  0x16   :  { %v45_v6 = vsel %vm41_vm0, %v40_v4, 0.0  ;;  %s112_s2 = scalar_lea.vmem %s69_s5, 256  ;;  %p117_p9 = scmp.lt.s32.totalorder %s69_s5, %s69_s5 }
  0x17   :  { %v42_v5 = vsel %vm41_vm0, %v39_v3, 0.0  ;;  %p113_p8 = scmp.ne.s32.totalorder %s69_s5, %s112_s2  ;;  %p118_p10 = scmp.lt.s32.totalorder %s112_s2, %s112_s2 }
  0x18   :  { %43 = vadd.xlane.f32.xlu0 %v42_v5 }
  0x19   :  { %p119_p11 = por %p118_p10, %p117_p9 }
  0x1b   :  { %p120_p12 = pnand %p119_p11, %p113_p8 }
  0x1c   :  { %46 = vadd.xlane.f32.xlu0 %v45_v6 }
  0xa5   :  { %v44_v8 = vpop.xlane.xlu0 %43 }
  0xa6   :  { %v49_v9 = vadd.f32 %v48_v7, %v44_v8 }
  0xa8   :  { %86 = vtanh.f32 %v49_v9 }
  0xa9   :  { %v47_v10 = vpop.xlane.xlu0 %46 }
  0xaa   :  { %v50_v11 = vadd.f32 %v48_v7, %v47_v10 }
  0xac   :  { %88 = vtanh.f32 %v50_v11 }
  0xb2   :  { %v87_v13 = vpop.eup %86 }
  0xb3   :  { %v57_v14 = vmul.f32 %v87_v13, %v81_v12 }
  0xb5   :  { %v59_v15 = vadd.f32 %v57_v14, %v33_v1 }
  0xb6   :  { %v89_v16 = vpop.eup %88 }
  0xb7   :  { %v58_v17 = vmul.f32 %v89_v16, %v81_v12  ;;  %61 = vst.msk [vmem:[#allocation6] sm:$0xff] %vm41_vm0, %v59_v15 }
  0xb9   :  { %v60_v18 = vadd.f32 %v58_v17, %v34_v2 }
  0xbb   :  { %62 = vst.msk [vmem:[#allocation6 + $0x8] sm:$0xff] %vm41_vm0, %v60_v18 }
  0xbc   :  { %123 = shalt.err (!%p120_p12)
}
  0xbd   :  { %s124_s7 = scalar_lea.hbm %s208_s3, 256 }
  0xbe   :  { %p125_p13 = scmp.ne.s32.totalorder %s208_s3, %s124_s7  ;;  %p128_p0 = scmp.lt.u32.totalorder %s124_s7, %s208_s3 }
  0xc0   :  { %p130_p1 = pnand %p128_p0, %p125_p13 }
  0xc2   :  { %133 = shalt.err (!%p130_p1)
}
  0xc3   :  { %74 = dma.vmem_to_hbm [thread:$0]  %s69_s5, 256, %s208_s3, [#allocation5], %s139_s22, %s139_s22, %s140_s23  }
  0xc4   :  { %136 = dma.done.wait [#allocation5], 256  }
  0xc5   :  { %137 = vsyncadd [#allocation5], 4294967040 }
  0xc6   :  { %78 = vsyncpa [#allocation4], 1 }
  0xc7   :  { %79 = vsyncpa [#allocation5], 1 }

</bundles_post_ra>
